<compile_context>
chip_gen: v6e
topology: v6e:2x2x1
jax: 0.10.0
libtpu: 0.0.40
codegen_flags: <defaults>
</compile_context>

<pallas_src>
import jax
import jax.numpy as jnp
from jax.experimental import pallas as pl
from jax.experimental.pallas import tpu as pltpu


def _mlp_kernel(x_ref, w1_ref, b1_ref, w2_ref, b2_ref, w3_ref, b3_ref,
                w4_ref, b4_ref, o_ref):
    # x_ref: (in_features, block_b) in VMEM; weights/biases are SMEM refs.
    # Activations are kept as Python lists of (1, block_b) rows so every op is
    # a full-width VPU op and no sublane concatenation is needed between layers.
    x = x_ref[...]
    rows = [x[k:k + 1, :] for k in range(x_ref.shape[0])]

    def dense(rows_in, w_ref, b_ref):
        in_dim, out_dim = w_ref.shape
        out_rows = []
        for j in range(out_dim):
            acc = rows_in[0] * w_ref[0, j]          # scalar (SMEM) * vector (VPU)
            for k in range(1, in_dim):
                acc = acc + rows_in[k] * w_ref[k, j]
            out_rows.append(acc + b_ref[j])
        return out_rows

    def sigmoid(rows_in):
        # exp on the EUP + approximate reciprocal on the EUP; VALU stays free
        # for the FMA/bias work of the dense layers.
        return [pl.reciprocal(1.0 + jnp.exp(-r), approx=True) for r in rows_in]

    h = sigmoid(dense(rows, w1_ref, b1_ref))
    h = sigmoid(dense(h, w2_ref, b2_ref))
    h = sigmoid(dense(h, w3_ref, b3_ref))
    out_rows = dense(h, w4_ref, b4_ref)             # final layer: no activation

    if len(out_rows) == 1:
        o_ref[...] = out_rows[0].astype(o_ref.dtype)
    else:
        o_ref[...] = jnp.concatenate(out_rows, axis=0).astype(o_ref.dtype)


def _round_up(x, m):
    return ((x + m - 1) // m) * m


def l3_sigmoid_lr(x, params, *, block_b=1024):
    """Forward pass of L3SigmoidLR.

    x: (B, in_features) float32
    params: dict with w1..w4 of shape (in_dim, out_dim) and b1..b4 of shape (out_dim,).
    block_b: batch tile (rows per grid step); rounded to a multiple of 128.
    """
    B, in_f = x.shape
    w1, b1 = params["w1"], params["b1"]
    w2, b2 = params["w2"], params["b2"]
    w3, b3 = params["w3"], params["b3"]
    w4, b4 = params["w4"], params["b4"]
    out_f = w4.shape[1]

    # Lane-aligned batch tile; never larger than the (padded) batch itself.
    block_b = min(_round_up(max(block_b, 128), 128), _round_up(B, 128))
    num_blocks = pl.cdiv(B, block_b)
    B_pad = num_blocks * block_b

    # Batch-on-lanes layout: (in_features, B_pad); zero-pad the ragged tail.
    x_t = jnp.transpose(x)
    if B_pad != B:
        x_t = jnp.pad(x_t, ((0, 0), (0, B_pad - B)))

    smem_spec = pl.BlockSpec(memory_space=pltpu.MemorySpace.SMEM)

    out_t = pl.pallas_call(
        _mlp_kernel,
        out_shape=jax.ShapeDtypeStruct((out_f, B_pad), x.dtype),
        grid_spec=pltpu.PrefetchScalarGridSpec(
            num_scalar_prefetch=0,
            grid=(num_blocks,),
            in_specs=[
                pl.BlockSpec((in_f, block_b), lambda i: (0, i)),   # x (lane-dense)
                smem_spec, smem_spec,                               # w1, b1
                smem_spec, smem_spec,                               # w2, b2
                smem_spec, smem_spec,                               # w3, b3
                smem_spec, smem_spec,                               # w4, b4
            ],
            out_specs=pl.BlockSpec((out_f, block_b), lambda i: (0, i)),
        ),
        compiler_params=pltpu.CompilerParams(
            dimension_semantics=("parallel",)),                     # megacore on v7x
    )(x_t, w1, b1, w2, b2, w3, b3, w4, b4)

    # Drop the padded tail and return the conventional (B, out_features) layout.
    return jnp.transpose(out_t[:, :B])


def init_params(key, in_features=2, hidden_dim=4, out_features=1):
    """Deterministic PyTorch-style (uniform +/- 1/sqrt(fan_in)) init."""
    dims = [(in_features, hidden_dim),
            (hidden_dim, hidden_dim),
            (hidden_dim, hidden_dim),
            (hidden_dim, out_features)]
    params = {}
    keys = jax.random.split(key, 2 * len(dims))
    for idx, (fan_in, fan_out) in enumerate(dims):
        bound = 1.0 / float(fan_in) ** 0.5
        w = jax.random.uniform(keys[2 * idx], (fan_in, fan_out),
                               minval=-bound, maxval=bound, dtype=jnp.float32)
        b = jax.random.uniform(keys[2 * idx + 1], (fan_out,),
                               minval=-bound, maxval=bound, dtype=jnp.float32)
        params[f"w{idx + 1}"] = w
        params[f"b{idx + 1}"] = b
    return params


def _reference(x, params):
    h = jax.nn.sigmoid(x @ params["w1"] + params["b1"])
    h = jax.nn.sigmoid(h @ params["w2"] + params["b2"])
    h = jax.nn.sigmoid(h @ params["w3"] + params["b3"])
    return h @ params["w4"] + params["b4"]


if __name__ == "__main__":
    key = jax.random.PRNGKey(0)
    k_x, k_p = jax.random.split(key)

    # Ragged batch (not a multiple of the tile) to exercise padding + a
    # multi-step ("parallel") grid: block_b=128 -> grid=(3,), B_pad=384.
    B, in_features, hidden_dim, out_features = 300, 2, 4, 1
    x = jax.random.normal(k_x, (B, in_features), dtype=jnp.float32)
    params = init_params(k_p, in_features, hidden_dim, out_features)

    out = l3_sigmoid_lr(x, params, block_b=128)
    out = jax.block_until_ready(out)

    ref = _reference(x, params)
    assert out.shape == (B, out_features)
    # Tolerance accounts for the EUP approximate reciprocal used in sigmoid.
    assert jnp.allclose(out, ref, atol=5e-3, rtol=5e-3), \
        float(jnp.max(jnp.abs(out - ref)))

    print("KERNEL_OK")
</pallas_src>

<mosaic_0001>
module attributes {stable_mosaic.version = 11 : i64} {
  func.func @_mlp_kernel(%arg0: i32, %arg1: memref<2x128xf32, #tpu.memory_space<vmem>>, %arg2: memref<2x4xf32, #tpu.memory_space<smem>>, %arg3: memref<4xf32, #tpu.memory_space<smem>>, %arg4: memref<4x4xf32, #tpu.memory_space<smem>>, %arg5: memref<4xf32, #tpu.memory_space<smem>>, %arg6: memref<4x4xf32, #tpu.memory_space<smem>>, %arg7: memref<4xf32, #tpu.memory_space<smem>>, %arg8: memref<4x1xf32, #tpu.memory_space<smem>>, %arg9: memref<1xf32, #tpu.memory_space<smem>>, %arg10: memref<1x128xf32, #tpu.memory_space<vmem>>) attributes {dimension_semantics = [#tpu.dimension_semantics<parallel>], iteration_bounds = array<i64: 3>, scalar_prefetch = 0 : i64, scratch_operands = 0 : i64, tpu.core_type = #tpu.core_type<tc>, window_params = [{transform_indices = @transform_0, window_bounds = array<i64: 2, 128>}, {transform_indices = @transform_1, window_bounds = array<i64: 2, 4>}, {transform_indices = @transform_2, window_bounds = array<i64: 4>}, {transform_indices = @transform_3, window_bounds = array<i64: 4, 4>}, {transform_indices = @transform_4, window_bounds = array<i64: 4>}, {transform_indices = @transform_5, window_bounds = array<i64: 4, 4>}, {transform_indices = @transform_6, window_bounds = array<i64: 4>}, {transform_indices = @transform_7, window_bounds = array<i64: 4, 1>}, {transform_indices = @transform_8, window_bounds = array<i64: 1>}, {transform_indices = @transform_9, window_bounds = array<i64: 1, 128>}]} {
    %c0 = arith.constant 0 : index
    %c0_0 = arith.constant 0 : index
    %0 = vector.load %arg1[%c0, %c0_0] : memref<2x128xf32, #tpu.memory_space<vmem>>, vector<2x128xf32>
    %1 = vector.extract_strided_slice %0 {offsets = [0, 0], sizes = [1, 128], strides = [1, 1]} : vector<2x128xf32> to vector<1x128xf32>
    %2 = vector.extract_strided_slice %0 {offsets = [1, 0], sizes = [1, 128], strides = [1, 1]} : vector<2x128xf32> to vector<1x128xf32>
    %c0_1 = arith.constant 0 : index
    %c0_2 = arith.constant 0 : index
    %3 = memref.load %arg2[%c0_1, %c0_2] : memref<2x4xf32, #tpu.memory_space<smem>>
    %4 = vector.broadcast %3 : f32 to vector<1x128xf32>
    %5 = arith.mulf %1, %4 : vector<1x128xf32>
    %c1 = arith.constant 1 : index
    %c0_3 = arith.constant 0 : index
    %6 = memref.load %arg2[%c1, %c0_3] : memref<2x4xf32, #tpu.memory_space<smem>>
    %7 = vector.broadcast %6 : f32 to vector<1x128xf32>
    %8 = arith.mulf %2, %7 : vector<1x128xf32>
    %9 = arith.addf %5, %8 : vector<1x128xf32>
    %c0_4 = arith.constant 0 : index
    %10 = memref.load %arg3[%c0_4] : memref<4xf32, #tpu.memory_space<smem>>
    %11 = vector.broadcast %10 : f32 to vector<1x128xf32>
    %12 = arith.addf %9, %11 : vector<1x128xf32>
    %c0_5 = arith.constant 0 : index
    %c1_6 = arith.constant 1 : index
    %13 = memref.load %arg2[%c0_5, %c1_6] : memref<2x4xf32, #tpu.memory_space<smem>>
    %14 = vector.broadcast %13 : f32 to vector<1x128xf32>
    %15 = arith.mulf %1, %14 : vector<1x128xf32>
    %c1_7 = arith.constant 1 : index
    %c1_8 = arith.constant 1 : index
    %16 = memref.load %arg2[%c1_7, %c1_8] : memref<2x4xf32, #tpu.memory_space<smem>>
    %17 = vector.broadcast %16 : f32 to vector<1x128xf32>
    %18 = arith.mulf %2, %17 : vector<1x128xf32>
    %19 = arith.addf %15, %18 : vector<1x128xf32>
    %c1_9 = arith.constant 1 : index
    %20 = memref.load %arg3[%c1_9] : memref<4xf32, #tpu.memory_space<smem>>
    %21 = vector.broadcast %20 : f32 to vector<1x128xf32>
    %22 = arith.addf %19, %21 : vector<1x128xf32>
    %c0_10 = arith.constant 0 : index
    %c2 = arith.constant 2 : index
    %23 = memref.load %arg2[%c0_10, %c2] : memref<2x4xf32, #tpu.memory_space<smem>>
    %24 = vector.broadcast %23 : f32 to vector<1x128xf32>
    %25 = arith.mulf %1, %24 : vector<1x128xf32>
    %c1_11 = arith.constant 1 : index
    %c2_12 = arith.constant 2 : index
    %26 = memref.load %arg2[%c1_11, %c2_12] : memref<2x4xf32, #tpu.memory_space<smem>>
    %27 = vector.broadcast %26 : f32 to vector<1x128xf32>
    %28 = arith.mulf %2, %27 : vector<1x128xf32>
    %29 = arith.addf %25, %28 : vector<1x128xf32>
    %c2_13 = arith.constant 2 : index
    %30 = memref.load %arg3[%c2_13] : memref<4xf32, #tpu.memory_space<smem>>
    %31 = vector.broadcast %30 : f32 to vector<1x128xf32>
    %32 = arith.addf %29, %31 : vector<1x128xf32>
    %c0_14 = arith.constant 0 : index
    %c3 = arith.constant 3 : index
    %33 = memref.load %arg2[%c0_14, %c3] : memref<2x4xf32, #tpu.memory_space<smem>>
    %34 = vector.broadcast %33 : f32 to vector<1x128xf32>
    %35 = arith.mulf %1, %34 : vector<1x128xf32>
    %c1_15 = arith.constant 1 : index
    %c3_16 = arith.constant 3 : index
    %36 = memref.load %arg2[%c1_15, %c3_16] : memref<2x4xf32, #tpu.memory_space<smem>>
    %37 = vector.broadcast %36 : f32 to vector<1x128xf32>
    %38 = arith.mulf %2, %37 : vector<1x128xf32>
    %39 = arith.addf %35, %38 : vector<1x128xf32>
    %c3_17 = arith.constant 3 : index
    %40 = memref.load %arg3[%c3_17] : memref<4xf32, #tpu.memory_space<smem>>
    %41 = vector.broadcast %40 : f32 to vector<1x128xf32>
    %42 = arith.addf %39, %41 : vector<1x128xf32>
    %cst = arith.constant 0.000000e+00 : f32
    %43 = vector.broadcast %cst : f32 to vector<1x128xf32>
    %44 = arith.subf %43, %12 : vector<1x128xf32>
    %45 = math.exp %44 : vector<1x128xf32>
    %cst_18 = arith.constant 1.000000e+00 : f32
    %46 = vector.broadcast %cst_18 : f32 to vector<1x128xf32>
    %47 = arith.addf %46, %45 : vector<1x128xf32>
    %48 = tpu.reciprocal %47 {approx = true} : vector<1x128xf32> -> vector<1x128xf32>
    %cst_19 = arith.constant 0.000000e+00 : f32
    %49 = vector.broadcast %cst_19 : f32 to vector<1x128xf32>
    %50 = arith.subf %49, %22 : vector<1x128xf32>
    %51 = math.exp %50 : vector<1x128xf32>
    %cst_20 = arith.constant 1.000000e+00 : f32
    %52 = vector.broadcast %cst_20 : f32 to vector<1x128xf32>
    %53 = arith.addf %52, %51 : vector<1x128xf32>
    %54 = tpu.reciprocal %53 {approx = true} : vector<1x128xf32> -> vector<1x128xf32>
    %cst_21 = arith.constant 0.000000e+00 : f32
    %55 = vector.broadcast %cst_21 : f32 to vector<1x128xf32>
    %56 = arith.subf %55, %32 : vector<1x128xf32>
    %57 = math.exp %56 : vector<1x128xf32>
    %cst_22 = arith.constant 1.000000e+00 : f32
    %58 = vector.broadcast %cst_22 : f32 to vector<1x128xf32>
    %59 = arith.addf %58, %57 : vector<1x128xf32>
    %60 = tpu.reciprocal %59 {approx = true} : vector<1x128xf32> -> vector<1x128xf32>
    %cst_23 = arith.constant 0.000000e+00 : f32
    %61 = vector.broadcast %cst_23 : f32 to vector<1x128xf32>
    %62 = arith.subf %61, %42 : vector<1x128xf32>
    %63 = math.exp %62 : vector<1x128xf32>
    %cst_24 = arith.constant 1.000000e+00 : f32
    %64 = vector.broadcast %cst_24 : f32 to vector<1x128xf32>
    %65 = arith.addf %64, %63 : vector<1x128xf32>
    %66 = tpu.reciprocal %65 {approx = true} : vector<1x128xf32> -> vector<1x128xf32>
    %c0_25 = arith.constant 0 : index
    %c0_26 = arith.constant 0 : index
    %67 = memref.load %arg4[%c0_25, %c0_26] : memref<4x4xf32, #tpu.memory_space<smem>>
    %68 = vector.broadcast %67 : f32 to vector<1x128xf32>
    %69 = arith.mulf %48, %68 : vector<1x128xf32>
    %c1_27 = arith.constant 1 : index
    %c0_28 = arith.constant 0 : index
    %70 = memref.load %arg4[%c1_27, %c0_28] : memref<4x4xf32, #tpu.memory_space<smem>>
    %71 = vector.broadcast %70 : f32 to vector<1x128xf32>
    %72 = arith.mulf %54, %71 : vector<1x128xf32>
    %73 = arith.addf %69, %72 : vector<1x128xf32>
    %c2_29 = arith.constant 2 : index
    %c0_30 = arith.constant 0 : index
    %74 = memref.load %arg4[%c2_29, %c0_30] : memref<4x4xf32, #tpu.memory_space<smem>>
    %75 = vector.broadcast %74 : f32 to vector<1x128xf32>
    %76 = arith.mulf %60, %75 : vector<1x128xf32>
    %77 = arith.addf %73, %76 : vector<1x128xf32>
    %c3_31 = arith.constant 3 : index
    %c0_32 = arith.constant 0 : index
    %78 = memref.load %arg4[%c3_31, %c0_32] : memref<4x4xf32, #tpu.memory_space<smem>>
    %79 = vector.broadcast %78 : f32 to vector<1x128xf32>
    %80 = arith.mulf %66, %79 : vector<1x128xf32>
    %81 = arith.addf %77, %80 : vector<1x128xf32>
    %c0_33 = arith.constant 0 : index
    %82 = memref.load %arg5[%c0_33] : memref<4xf32, #tpu.memory_space<smem>>
    %83 = vector.broadcast %82 : f32 to vector<1x128xf32>
    %84 = arith.addf %81, %83 : vector<1x128xf32>
    %c0_34 = arith.constant 0 : index
    %c1_35 = arith.constant 1 : index
    %85 = memref.load %arg4[%c0_34, %c1_35] : memref<4x4xf32, #tpu.memory_space<smem>>
    %86 = vector.broadcast %85 : f32 to vector<1x128xf32>
    %87 = arith.mulf %48, %86 : vector<1x128xf32>
    %c1_36 = arith.constant 1 : index
    %c1_37 = arith.constant 1 : index
    %88 = memref.load %arg4[%c1_36, %c1_37] : memref<4x4xf32, #tpu.memory_space<smem>>
    %89 = vector.broadcast %88 : f32 to vector<1x128xf32>
    %90 = arith.mulf %54, %89 : vector<1x128xf32>
    %91 = arith.addf %87, %90 : vector<1x128xf32>
    %c2_38 = arith.constant 2 : index
    %c1_39 = arith.constant 1 : index
    %92 = memref.load %arg4[%c2_38, %c1_39] : memref<4x4xf32, #tpu.memory_space<smem>>
    %93 = vector.broadcast %92 : f32 to vector<1x128xf32>
    %94 = arith.mulf %60, %93 : vector<1x128xf32>
    %95 = arith.addf %91, %94 : vector<1x128xf32>
    %c3_40 = arith.constant 3 : index
    %c1_41 = arith.constant 1 : index
    %96 = memref.load %arg4[%c3_40, %c1_41] : memref<4x4xf32, #tpu.memory_space<smem>>
    %97 = vector.broadcast %96 : f32 to vector<1x128xf32>
    %98 = arith.mulf %66, %97 : vector<1x128xf32>
    %99 = arith.addf %95, %98 : vector<1x128xf32>
    %c1_42 = arith.constant 1 : index
    %100 = memref.load %arg5[%c1_42] : memref<4xf32, #tpu.memory_space<smem>>
    %101 = vector.broadcast %100 : f32 to vector<1x128xf32>
    %102 = arith.addf %99, %101 : vector<1x128xf32>
    %c0_43 = arith.constant 0 : index
    %c2_44 = arith.constant 2 : index
    %103 = memref.load %arg4[%c0_43, %c2_44] : memref<4x4xf32, #tpu.memory_space<smem>>
    %104 = vector.broadcast %103 : f32 to vector<1x128xf32>
    %105 = arith.mulf %48, %104 : vector<1x128xf32>
    %c1_45 = arith.constant 1 : index
    %c2_46 = arith.constant 2 : index
    %106 = memref.load %arg4[%c1_45, %c2_46] : memref<4x4xf32, #tpu.memory_space<smem>>
    %107 = vector.broadcast %106 : f32 to vector<1x128xf32>
    %108 = arith.mulf %54, %107 : vector<1x128xf32>
    %109 = arith.addf %105, %108 : vector<1x128xf32>
    %c2_47 = arith.constant 2 : index
    %c2_48 = arith.constant 2 : index
    %110 = memref.load %arg4[%c2_47, %c2_48] : memref<4x4xf32, #tpu.memory_space<smem>>
    %111 = vector.broadcast %110 : f32 to vector<1x128xf32>
    %112 = arith.mulf %60, %111 : vector<1x128xf32>
    %113 = arith.addf %109, %112 : vector<1x128xf32>
    %c3_49 = arith.constant 3 : index
    %c2_50 = arith.constant 2 : index
    %114 = memref.load %arg4[%c3_49, %c2_50] : memref<4x4xf32, #tpu.memory_space<smem>>
    %115 = vector.broadcast %114 : f32 to vector<1x128xf32>
    %116 = arith.mulf %66, %115 : vector<1x128xf32>
    %117 = arith.addf %113, %116 : vector<1x128xf32>
    %c2_51 = arith.constant 2 : index
    %118 = memref.load %arg5[%c2_51] : memref<4xf32, #tpu.memory_space<smem>>
    %119 = vector.broadcast %118 : f32 to vector<1x128xf32>
    %120 = arith.addf %117, %119 : vector<1x128xf32>
    %c0_52 = arith.constant 0 : index
    %c3_53 = arith.constant 3 : index
    %121 = memref.load %arg4[%c0_52, %c3_53] : memref<4x4xf32, #tpu.memory_space<smem>>
    %122 = vector.broadcast %121 : f32 to vector<1x128xf32>
    %123 = arith.mulf %48, %122 : vector<1x128xf32>
    %c1_54 = arith.constant 1 : index
    %c3_55 = arith.constant 3 : index
    %124 = memref.load %arg4[%c1_54, %c3_55] : memref<4x4xf32, #tpu.memory_space<smem>>
    %125 = vector.broadcast %124 : f32 to vector<1x128xf32>
    %126 = arith.mulf %54, %125 : vector<1x128xf32>
    %127 = arith.addf %123, %126 : vector<1x128xf32>
    %c2_56 = arith.constant 2 : index
    %c3_57 = arith.constant 3 : index
    %128 = memref.load %arg4[%c2_56, %c3_57] : memref<4x4xf32, #tpu.memory_space<smem>>
    %129 = vector.broadcast %128 : f32 to vector<1x128xf32>
    %130 = arith.mulf %60, %129 : vector<1x128xf32>
    %131 = arith.addf %127, %130 : vector<1x128xf32>
    %c3_58 = arith.constant 3 : index
    %c3_59 = arith.constant 3 : index
    %132 = memref.load %arg4[%c3_58, %c3_59] : memref<4x4xf32, #tpu.memory_space<smem>>
    %133 = vector.broadcast %132 : f32 to vector<1x128xf32>
    %134 = arith.mulf %66, %133 : vector<1x128xf32>
    %135 = arith.addf %131, %134 : vector<1x128xf32>
    %c3_60 = arith.constant 3 : index
    %136 = memref.load %arg5[%c3_60] : memref<4xf32, #tpu.memory_space<smem>>
    %137 = vector.broadcast %136 : f32 to vector<1x128xf32>
    %138 = arith.addf %135, %137 : vector<1x128xf32>
    %cst_61 = arith.constant 0.000000e+00 : f32
    %139 = vector.broadcast %cst_61 : f32 to vector<1x128xf32>
    %140 = arith.subf %139, %84 : vector<1x128xf32>
    %141 = math.exp %140 : vector<1x128xf32>
    %cst_62 = arith.constant 1.000000e+00 : f32
    %142 = vector.broadcast %cst_62 : f32 to vector<1x128xf32>
    %143 = arith.addf %142, %141 : vector<1x128xf32>
    %144 = tpu.reciprocal %143 {approx = true} : vector<1x128xf32> -> vector<1x128xf32>
    %cst_63 = arith.constant 0.000000e+00 : f32
    %145 = vector.broadcast %cst_63 : f32 to vector<1x128xf32>
    %146 = arith.subf %145, %102 : vector<1x128xf32>
    %147 = math.exp %146 : vector<1x128xf32>
    %cst_64 = arith.constant 1.000000e+00 : f32
    %148 = vector.broadcast %cst_64 : f32 to vector<1x128xf32>
    %149 = arith.addf %148, %147 : vector<1x128xf32>
    %150 = tpu.reciprocal %149 {approx = true} : vector<1x128xf32> -> vector<1x128xf32>
    %cst_65 = arith.constant 0.000000e+00 : f32
    %151 = vector.broadcast %cst_65 : f32 to vector<1x128xf32>
    %152 = arith.subf %151, %120 : vector<1x128xf32>
    %153 = math.exp %152 : vector<1x128xf32>
    %cst_66 = arith.constant 1.000000e+00 : f32
    %154 = vector.broadcast %cst_66 : f32 to vector<1x128xf32>
    %155 = arith.addf %154, %153 : vector<1x128xf32>
    %156 = tpu.reciprocal %155 {approx = true} : vector<1x128xf32> -> vector<1x128xf32>
    %cst_67 = arith.constant 0.000000e+00 : f32
    %157 = vector.broadcast %cst_67 : f32 to vector<1x128xf32>
    %158 = arith.subf %157, %138 : vector<1x128xf32>
    %159 = math.exp %158 : vector<1x128xf32>
    %cst_68 = arith.constant 1.000000e+00 : f32
    %160 = vector.broadcast %cst_68 : f32 to vector<1x128xf32>
    %161 = arith.addf %160, %159 : vector<1x128xf32>
    %162 = tpu.reciprocal %161 {approx = true} : vector<1x128xf32> -> vector<1x128xf32>
    %c0_69 = arith.constant 0 : index
    %c0_70 = arith.constant 0 : index
    %163 = memref.load %arg6[%c0_69, %c0_70] : memref<4x4xf32, #tpu.memory_space<smem>>
    %164 = vector.broadcast %163 : f32 to vector<1x128xf32>
    %165 = arith.mulf %144, %164 : vector<1x128xf32>
    %c1_71 = arith.constant 1 : index
    %c0_72 = arith.constant 0 : index
    %166 = memref.load %arg6[%c1_71, %c0_72] : memref<4x4xf32, #tpu.memory_space<smem>>
    %167 = vector.broadcast %166 : f32 to vector<1x128xf32>
    %168 = arith.mulf %150, %167 : vector<1x128xf32>
    %169 = arith.addf %165, %168 : vector<1x128xf32>
    %c2_73 = arith.constant 2 : index
    %c0_74 = arith.constant 0 : index
    %170 = memref.load %arg6[%c2_73, %c0_74] : memref<4x4xf32, #tpu.memory_space<smem>>
    %171 = vector.broadcast %170 : f32 to vector<1x128xf32>
    %172 = arith.mulf %156, %171 : vector<1x128xf32>
    %173 = arith.addf %169, %172 : vector<1x128xf32>
    %c3_75 = arith.constant 3 : index
    %c0_76 = arith.constant 0 : index
    %174 = memref.load %arg6[%c3_75, %c0_76] : memref<4x4xf32, #tpu.memory_space<smem>>
    %175 = vector.broadcast %174 : f32 to vector<1x128xf32>
    %176 = arith.mulf %162, %175 : vector<1x128xf32>
    %177 = arith.addf %173, %176 : vector<1x128xf32>
    %c0_77 = arith.constant 0 : index
    %178 = memref.load %arg7[%c0_77] : memref<4xf32, #tpu.memory_space<smem>>
    %179 = vector.broadcast %178 : f32 to vector<1x128xf32>
    %180 = arith.addf %177, %179 : vector<1x128xf32>
    %c0_78 = arith.constant 0 : index
    %c1_79 = arith.constant 1 : index
    %181 = memref.load %arg6[%c0_78, %c1_79] : memref<4x4xf32, #tpu.memory_space<smem>>
    %182 = vector.broadcast %181 : f32 to vector<1x128xf32>
    %183 = arith.mulf %144, %182 : vector<1x128xf32>
    %c1_80 = arith.constant 1 : index
    %c1_81 = arith.constant 1 : index
    %184 = memref.load %arg6[%c1_80, %c1_81] : memref<4x4xf32, #tpu.memory_space<smem>>
    %185 = vector.broadcast %184 : f32 to vector<1x128xf32>
    %186 = arith.mulf %150, %185 : vector<1x128xf32>
    %187 = arith.addf %183, %186 : vector<1x128xf32>
    %c2_82 = arith.constant 2 : index
    %c1_83 = arith.constant 1 : index
    %188 = memref.load %arg6[%c2_82, %c1_83] : memref<4x4xf32, #tpu.memory_space<smem>>
    %189 = vector.broadcast %188 : f32 to vector<1x128xf32>
    %190 = arith.mulf %156, %189 : vector<1x128xf32>
    %191 = arith.addf %187, %190 : vector<1x128xf32>
    %c3_84 = arith.constant 3 : index
    %c1_85 = arith.constant 1 : index
    %192 = memref.load %arg6[%c3_84, %c1_85] : memref<4x4xf32, #tpu.memory_space<smem>>
    %193 = vector.broadcast %192 : f32 to vector<1x128xf32>
    %194 = arith.mulf %162, %193 : vector<1x128xf32>
    %195 = arith.addf %191, %194 : vector<1x128xf32>
    %c1_86 = arith.constant 1 : index
    %196 = memref.load %arg7[%c1_86] : memref<4xf32, #tpu.memory_space<smem>>
    %197 = vector.broadcast %196 : f32 to vector<1x128xf32>
    %198 = arith.addf %195, %197 : vector<1x128xf32>
    %c0_87 = arith.constant 0 : index
    %c2_88 = arith.constant 2 : index
    %199 = memref.load %arg6[%c0_87, %c2_88] : memref<4x4xf32, #tpu.memory_space<smem>>
    %200 = vector.broadcast %199 : f32 to vector<1x128xf32>
    %201 = arith.mulf %144, %200 : vector<1x128xf32>
    %c1_89 = arith.constant 1 : index
    %c2_90 = arith.constant 2 : index
    %202 = memref.load %arg6[%c1_89, %c2_90] : memref<4x4xf32, #tpu.memory_space<smem>>
    %203 = vector.broadcast %202 : f32 to vector<1x128xf32>
    %204 = arith.mulf %150, %203 : vector<1x128xf32>
    %205 = arith.addf %201, %204 : vector<1x128xf32>
    %c2_91 = arith.constant 2 : index
    %c2_92 = arith.constant 2 : index
    %206 = memref.load %arg6[%c2_91, %c2_92] : memref<4x4xf32, #tpu.memory_space<smem>>
    %207 = vector.broadcast %206 : f32 to vector<1x128xf32>
    %208 = arith.mulf %156, %207 : vector<1x128xf32>
    %209 = arith.addf %205, %208 : vector<1x128xf32>
    %c3_93 = arith.constant 3 : index
    %c2_94 = arith.constant 2 : index
    %210 = memref.load %arg6[%c3_93, %c2_94] : memref<4x4xf32, #tpu.memory_space<smem>>
    %211 = vector.broadcast %210 : f32 to vector<1x128xf32>
    %212 = arith.mulf %162, %211 : vector<1x128xf32>
    %213 = arith.addf %209, %212 : vector<1x128xf32>
    %c2_95 = arith.constant 2 : index
    %214 = memref.load %arg7[%c2_95] : memref<4xf32, #tpu.memory_space<smem>>
    %215 = vector.broadcast %214 : f32 to vector<1x128xf32>
    %216 = arith.addf %213, %215 : vector<1x128xf32>
    %c0_96 = arith.constant 0 : index
    %c3_97 = arith.constant 3 : index
    %217 = memref.load %arg6[%c0_96, %c3_97] : memref<4x4xf32, #tpu.memory_space<smem>>
    %218 = vector.broadcast %217 : f32 to vector<1x128xf32>
    %219 = arith.mulf %144, %218 : vector<1x128xf32>
    %c1_98 = arith.constant 1 : index
    %c3_99 = arith.constant 3 : index
    %220 = memref.load %arg6[%c1_98, %c3_99] : memref<4x4xf32, #tpu.memory_space<smem>>
    %221 = vector.broadcast %220 : f32 to vector<1x128xf32>
    %222 = arith.mulf %150, %221 : vector<1x128xf32>
    %223 = arith.addf %219, %222 : vector<1x128xf32>
    %c2_100 = arith.constant 2 : index
    %c3_101 = arith.constant 3 : index
    %224 = memref.load %arg6[%c2_100, %c3_101] : memref<4x4xf32, #tpu.memory_space<smem>>
    %225 = vector.broadcast %224 : f32 to vector<1x128xf32>
    %226 = arith.mulf %156, %225 : vector<1x128xf32>
    %227 = arith.addf %223, %226 : vector<1x128xf32>
    %c3_102 = arith.constant 3 : index
    %c3_103 = arith.constant 3 : index
    %228 = memref.load %arg6[%c3_102, %c3_103] : memref<4x4xf32, #tpu.memory_space<smem>>
    %229 = vector.broadcast %228 : f32 to vector<1x128xf32>
    %230 = arith.mulf %162, %229 : vector<1x128xf32>
    %231 = arith.addf %227, %230 : vector<1x128xf32>
    %c3_104 = arith.constant 3 : index
    %232 = memref.load %arg7[%c3_104] : memref<4xf32, #tpu.memory_space<smem>>
    %233 = vector.broadcast %232 : f32 to vector<1x128xf32>
    %234 = arith.addf %231, %233 : vector<1x128xf32>
    %cst_105 = arith.constant 0.000000e+00 : f32
    %235 = vector.broadcast %cst_105 : f32 to vector<1x128xf32>
    %236 = arith.subf %235, %180 : vector<1x128xf32>
    %237 = math.exp %236 : vector<1x128xf32>
    %cst_106 = arith.constant 1.000000e+00 : f32
    %238 = vector.broadcast %cst_106 : f32 to vector<1x128xf32>
    %239 = arith.addf %238, %237 : vector<1x128xf32>
    %240 = tpu.reciprocal %239 {approx = true} : vector<1x128xf32> -> vector<1x128xf32>
    %cst_107 = arith.constant 0.000000e+00 : f32
    %241 = vector.broadcast %cst_107 : f32 to vector<1x128xf32>
    %242 = arith.subf %241, %198 : vector<1x128xf32>
    %243 = math.exp %242 : vector<1x128xf32>
    %cst_108 = arith.constant 1.000000e+00 : f32
    %244 = vector.broadcast %cst_108 : f32 to vector<1x128xf32>
    %245 = arith.addf %244, %243 : vector<1x128xf32>
    %246 = tpu.reciprocal %245 {approx = true} : vector<1x128xf32> -> vector<1x128xf32>
    %cst_109 = arith.constant 0.000000e+00 : f32
    %247 = vector.broadcast %cst_109 : f32 to vector<1x128xf32>
    %248 = arith.subf %247, %216 : vector<1x128xf32>
    %249 = math.exp %248 : vector<1x128xf32>
    %cst_110 = arith.constant 1.000000e+00 : f32
    %250 = vector.broadcast %cst_110 : f32 to vector<1x128xf32>
    %251 = arith.addf %250, %249 : vector<1x128xf32>
    %252 = tpu.reciprocal %251 {approx = true} : vector<1x128xf32> -> vector<1x128xf32>
    %cst_111 = arith.constant 0.000000e+00 : f32
    %253 = vector.broadcast %cst_111 : f32 to vector<1x128xf32>
    %254 = arith.subf %253, %234 : vector<1x128xf32>
    %255 = math.exp %254 : vector<1x128xf32>
    %cst_112 = arith.constant 1.000000e+00 : f32
    %256 = vector.broadcast %cst_112 : f32 to vector<1x128xf32>
    %257 = arith.addf %256, %255 : vector<1x128xf32>
    %258 = tpu.reciprocal %257 {approx = true} : vector<1x128xf32> -> vector<1x128xf32>
    %c0_113 = arith.constant 0 : index
    %c0_114 = arith.constant 0 : index
    %259 = memref.load %arg8[%c0_113, %c0_114] : memref<4x1xf32, #tpu.memory_space<smem>>
    %260 = vector.broadcast %259 : f32 to vector<1x128xf32>
    %261 = arith.mulf %240, %260 : vector<1x128xf32>
    %c1_115 = arith.constant 1 : index
    %c0_116 = arith.constant 0 : index
    %262 = memref.load %arg8[%c1_115, %c0_116] : memref<4x1xf32, #tpu.memory_space<smem>>
    %263 = vector.broadcast %262 : f32 to vector<1x128xf32>
    %264 = arith.mulf %246, %263 : vector<1x128xf32>
    %265 = arith.addf %261, %264 : vector<1x128xf32>
    %c2_117 = arith.constant 2 : index
    %c0_118 = arith.constant 0 : index
    %266 = memref.load %arg8[%c2_117, %c0_118] : memref<4x1xf32, #tpu.memory_space<smem>>
    %267 = vector.broadcast %266 : f32 to vector<1x128xf32>
    %268 = arith.mulf %252, %267 : vector<1x128xf32>
    %269 = arith.addf %265, %268 : vector<1x128xf32>
    %c3_119 = arith.constant 3 : index
    %c0_120 = arith.constant 0 : index
    %270 = memref.load %arg8[%c3_119, %c0_120] : memref<4x1xf32, #tpu.memory_space<smem>>
    %271 = vector.broadcast %270 : f32 to vector<1x128xf32>
    %272 = arith.mulf %258, %271 : vector<1x128xf32>
    %273 = arith.addf %269, %272 : vector<1x128xf32>
    %c0_121 = arith.constant 0 : index
    %274 = memref.load %arg9[%c0_121] : memref<1xf32, #tpu.memory_space<smem>>
    %275 = vector.broadcast %274 : f32 to vector<1x128xf32>
    %276 = arith.addf %273, %275 : vector<1x128xf32>
    %c0_122 = arith.constant 0 : index
    %c0_123 = arith.constant 0 : index
    %277 = vector.load %arg10[%c0_122, %c0_123] : memref<1x128xf32, #tpu.memory_space<vmem>>, vector<1x128xf32>
    tpu.vector_store %arg10[%c0_122, %c0_123], %276 {strides = array<i32>} : memref<1x128xf32, #tpu.memory_space<vmem>>, vector<1x128xf32>,
    return
  }
  func.func @transform_0(%arg0: i32) -> (i32, i32) {
    %c0_i32 = arith.constant 0 : i32
    %c0_i32_0 = arith.constant 0 : i32
    return %c0_i32, %arg0 : i32, i32
  }
  func.func @transform_1(%arg0: i32) -> (i32, i32) {
    %c0_i32 = arith.constant 0 : i32
    %c0_i32_0 = arith.constant 0 : i32
    %c0_i32_1 = arith.constant 0 : i32
    return %c0_i32, %c0_i32_0 : i32, i32
  }
  func.func @transform_2(%arg0: i32) -> i32 {
    %c0_i32 = arith.constant 0 : i32
    %c0_i32_0 = arith.constant 0 : i32
    return %c0_i32 : i32
  }
  func.func @transform_3(%arg0: i32) -> (i32, i32) {
    %c0_i32 = arith.constant 0 : i32
    %c0_i32_0 = arith.constant 0 : i32
    %c0_i32_1 = arith.constant 0 : i32
    return %c0_i32, %c0_i32_0 : i32, i32
  }
  func.func @transform_4(%arg0: i32) -> i32 {
    %c0_i32 = arith.constant 0 : i32
    %c0_i32_0 = arith.constant 0 : i32
    return %c0_i32 : i32
  }
  func.func @transform_5(%arg0: i32) -> (i32, i32) {
    %c0_i32 = arith.constant 0 : i32
    %c0_i32_0 = arith.constant 0 : i32
    %c0_i32_1 = arith.constant 0 : i32
    return %c0_i32, %c0_i32_0 : i32, i32
  }
  func.func @transform_6(%arg0: i32) -> i32 {
    %c0_i32 = arith.constant 0 : i32
    %c0_i32_0 = arith.constant 0 : i32
    return %c0_i32 : i32
  }
  func.func @transform_7(%arg0: i32) -> (i32, i32) {
    %c0_i32 = arith.constant 0 : i32
    %c0_i32_0 = arith.constant 0 : i32
    %c0_i32_1 = arith.constant 0 : i32
    return %c0_i32, %c0_i32_0 : i32, i32
  }
  func.func @transform_8(%arg0: i32) -> i32 {
    %c0_i32 = arith.constant 0 : i32
    %c0_i32_0 = arith.constant 0 : i32
    return %c0_i32 : i32
  }
  func.func @transform_9(%arg0: i32) -> (i32, i32) {
    %c0_i32 = arith.constant 0 : i32
    %c0_i32_0 = arith.constant 0 : i32
    return %c0_i32, %arg0 : i32, i32
  }
}

</mosaic_0001>

<bundles_post_ra>
// kernel: tpu_custom_call.1
= control target key start
LH: loop header
LB: loop body
LE: loop exit
PB: predicated region body
PF: predicated region fallthrough
CT: control target
= control target key end

     0   :  { %s1590_s0 = inlined_call_operand.vmem [shape: f32[2,384], index: 0, kind: input, shape index: {}]   ;;  %s1591_s1 = inlined_call_operand.hbm [shape: f32[2,4], index: 1, kind: input, shape index: {}]   ;;  %s1592_s2 = inlined_call_operand.hbm [shape: f32[4], index: 2, kind: input, shape index: {}]   ;;  %s1593_s3 = inlined_call_operand.vmem [shape: f32[4,4], index: 3, kind: input, shape index: {}]   ;;  %s1594_s4 = inlined_call_operand.hbm [shape: f32[4], index: 4, kind: input, shape index: {}]   ;;  %s1595_s5 = inlined_call_operand.vmem [shape: f32[4,4], index: 5, kind: input, shape index: {}]   ;;  %s1596_s6 = inlined_call_operand.vmem [shape: f32[4], index: 6, kind: input, shape index: {}]   ;;  %s1597_s7 = inlined_call_operand.vmem [shape: f32[4,1], index: 7, kind: input, shape index: {}]   ;;  %s1598_s8 = inlined_call_operand.<no memory space> [shape: f32[1], index: 8, kind: input, shape index: {}]   ;;  %s1599_s9 = inlined_call_operand.hbm [shape: f32[1,384], index: 9, kind: output, shape index: {}]  }
   0x1   :  { %1601 = sst [smem:[#allocation24_spill]] %s1590_s0 }
   0x2   :  { %1602 = sst [smem:[#allocation25_spill]] %s1591_s1 }
   0x3   :  { %1603 = sst [smem:[#allocation26_spill]] %s1592_s2 }
   0x4   :  { %1604 = sst [smem:[#allocation27_spill]] %s1593_s3 }
   0x5   :  { %1605 = sst [smem:[#allocation28_spill]] %s1594_s4 }
   0x6   :  { %1606 = sst [smem:[#allocation29_spill]] %s1595_s5 }
   0x7   :  { %14 = sst [smem:[#allocation2]] %s1598_s8 }
   0x8   :  { %15 = vsyncpa [#allocation5], 0 }
   0x9   :  { %16 = vsyncpa [#allocation8], 0 }
   0xa   :  { %17 = vsyncpa [#allocation6], 0 }
   0xb   :  { %18 = vsyncpa [#allocation12], 0 }
   0xc   :  { %19 = vsyncpa [#allocation15], 0 }
   0xd   :  { %20 = vsyncpa [#allocation4], 0 }
   0xe   :  { %22 = vsyncpa [#allocation4 + $0x1], 0  ;;  %s1297_s11 = smov 0   ;;  %s1299_s12 = smov 0  }
   0xf   :  { %s1301_s13 = smov 0   ;;  %s1303_s14 = smov 0  }
  0x10 LB: > { %s1318_s8 = sadd.s32 4294967295, %s1234_s14   ;;  %s828_s15 = sadd.s32 4294967294, %s1234_s14   ;;  %s1234_s14 = sphi %s1303_s14, %s1632_s14   ;;  %s1230_s13 = sphi %s1301_s13, %s1631_s13   ;;  %s1226_s12 = sphi %s1299_s12, %s1630_s12   ;;  %s1222_s11 = sphi %s1297_s11, %s1629_s11  }
  0x11   : > { %s1322_s16 = sadd.s32 1, %s1234_s14   ;;  %s229_s17 = sadd.s32 1, %s1230_s13 }
  0x12   : > { %s226_s18 = ssub.s32 %s1234_s14, %s1322_s16  ;;  %p239_p0 = scmp.ne.s32.totalorder %s1230_s13, %s1226_s12 }
  0x13   : > { %p227_p1 = scmp.eq.s32.totalorder %s226_s18, 0  ;;  %p240_p2 = scmp.eq.s32.totalorder %s1318_s8, 2 }
  0x14   : > { %p245_p3 = scmp.ne.s32.totalorder %s1226_s12, %s1222_s11  ;;  %p246_p4 = scmp.eq.s32.totalorder %s828_s15, 2 }
  0x15   : > { %s1333_s19 = scalar_select %p227_p1, %s1230_s13, %s229_s17  }
  0x16   : > { %p1335_p5 = por %p240_p2, %p239_p0  ;;  %p1339_p6 = por %p246_p4, %p245_p3 }
  0x17   : > { %p829_p7 = scmp.ge.s32.totalorder %s1234_s14, 1  ;;  %p253_p8 = scmp.lt.s32.totalorder %s1234_s14, 4 }
  0x18   : > { %p1600_p9 = scmp.eq.s32.totalorder %s1318_s8, 0  ;;  %s1610_s5 = sld [smem:[#allocation29_spill]] }
  0x19   : > { %p1346_p10 = pnand %p829_p7, %p253_p8  ;;  %s1611_s3 = sld [smem:[#allocation27_spill]] }
  0x1a   : > { %s315_s15 = sshll.u32 %s1596_s6, 4  ;;  %s1236_s17 = smov [#allocation7]   ;;  %s316_s15 = int_to_ptr.vmem [resolvable:$true] %s315_s15 }
  0x1b   : > { %p929_p11 = pneg %p1346_p10  ;;  %s1613_s2 = sld [smem:[#allocation26_spill]] }
  0x1d   : > { %p1360_p12 = pnand %p1600_p9, %p929_p11 }
  0x1e   : > { %s304_s25 = sshll.u32 %s1610_s5, 4  ;;  %s305_s25 = int_to_ptr.vmem [resolvable:$true] %s304_s25 }
  0x1f   : > { %s284_s28 = sshll.u32 %s1611_s3, 4  ;;  %s1068_s24 = scalar_lea.vmem %s305_s25, 64  ;;  %s285_s28 = int_to_ptr.vmem [resolvable:$true] %s284_s28 }
  0x20   : > { %p1069_p13 = scmp.ne.s32.totalorder %s305_s25, %s1068_s24  ;;  %p1070_p0 = pneg %p1360_p12 }
  0x21   : > { %935 = dma.hbm_to_smem (!%p1360_p12), %s1613_s2, 16, %s1236_s17, [#allocation8]  }
  0x22   : > { %p1071_p1 = pnand %p1070_p0, %p1069_p13  ;;  %p1076_p3 = scmp.lt.s32.totalorder %s305_s25, %s305_s25 }
  0x23   : > { %p1077_p4 = scmp.lt.s32.totalorder %s1068_s24, %s1068_s24 }
  0x24   : > { %p1072_p2 = pneg %p1071_p1 }
  0x25   : > { %p1078_p7 = por %p1077_p4, %p1076_p3 }
  0x27   : > { %p1079_p8 = pnand %p1078_p7, %p1072_p2 }
  0x29   : > { %1082 = shalt.err (!%p1079_p8)
}
  0x2a   : > { %s1237_s26 = smov [#allocation11]   ;;  %s1238_s27 = smov [#allocation3]  }
  0x2b   : > { %944 = dma.vmem_to_smem (!%p1360_p12), %s305_s25, 64, %s1237_s26, [#allocation12]  }
  0x2c   : > { %s1614_s1 = sld [smem:[#allocation25_spill]]  ;;  %s1094_s17 = scalar_lea.vmem %s285_s28, 64 }
  0x2d   : > { %p1095_p11 = scmp.ne.s32.totalorder %s285_s28, %s1094_s17  ;;  %p1102_p2 = scmp.lt.s32.totalorder %s285_s28, %s285_s28 }
  0x2e   : > { %p1103_p3 = scmp.lt.s32.totalorder %s1094_s17, %s1094_s17 }
  0x2f   : > { %p1097_p13 = pnand %p1095_p11, %p1070_p0 }
  0x30   : > { %p1104_p4 = por %p1103_p3, %p1102_p2 }
  0x31   : > { %p1098_p1 = pneg %p1097_p13 }
  0x32   : > { %932 = dma.hbm_to_smem (!%p1360_p12), %s1614_s1, 32, %s1238_s27, [#allocation5]  }
  0x33   : > { %p1105_p7 = pnand %p1104_p4, %p1098_p1 }
  0x35   : > { %1108 = shalt.err (!%p1105_p7)
}
  0x36   : > { %s1239_s18 = smov [#allocation9]   ;;  %s1240_s25 = smov [#allocation10]  }
  0x37   : > { %938 = dma.vmem_to_smem (!%p1360_p12), %s285_s28, 64, %s1239_s18, [#allocation6]  }
  0x38   : > { %s1615_s4 = sld [smem:[#allocation28_spill]]  ;;  %s1120_s30 = scalar_lea.vmem %s316_s15, 16 }
  0x39   : > { %p1121_p8 = scmp.ne.s32.totalorder %s316_s15, %s1120_s30  ;;  %p1128_p1 = scmp.lt.s32.totalorder %s316_s15, %s316_s15 }
  0x3a   : > { %p1129_p2 = scmp.lt.s32.totalorder %s1120_s30, %s1120_s30 }
  0x3b   : > { %p1123_p11 = pnand %p1121_p8, %p1070_p0 }
  0x3c   : > { %p1130_p3 = por %p1129_p2, %p1128_p1 }
  0x3d   : > { %p1124_p13 = pneg %p1123_p11 }
  0x3e   : > { %941 = dma.hbm_to_smem (!%p1360_p12), %s1615_s4, 16, %s1240_s25, [#allocation8]  }
  0x3f   : > { %p1131_p4 = pnand %p1130_p3, %p1124_p13 }
  0x41   : > { %1134 = shalt.err (!%p1131_p4)
}
  0x42   : > { %s1241_s28 = smov [#allocation13]   ;;  %s326_s18 = sshll.u32 %s1597_s7, 4  ;;  %s327_s18 = int_to_ptr.vmem [resolvable:$true] %s326_s18 }
  0x43   : > { %947 = dma.vmem_to_smem (!%p1360_p12), %s316_s15, 16, %s1241_s28, [#allocation12]  }
  0x44   : > { %s1135_s25 = scalar_lea.vmem %s327_s18, 64  ;;  %p1143_p9 = scmp.lt.s32.totalorder %s327_s18, %s327_s18 }
  0x45   : > { %p1136_p7 = scmp.ne.s32.totalorder %s327_s18, %s1135_s25  ;;  %p1144_p1 = scmp.lt.s32.totalorder %s1135_s25, %s1135_s25 }
  0x47   : > { %p1138_p8 = pnand %p1136_p7, %p1070_p0  ;;  %p1145_p13 = por %p1144_p1, %p1143_p9 }
  0x49   : > { %p1139_p11 = pneg %p1138_p8 }
  0x4b   : > { %p1146_p2 = pnand %p1145_p13, %p1139_p11 }
  0x4d   : > { %1149 = shalt.err (!%p1146_p2)
}
  0x4e   : > { %s1242_s23 = smov [#allocation14]   ;;  %349 = sbr.rel (%p1346_p10) target bundleno = 272 (0x110), region = 56 }
  0x4f   : > { %950 = dma.vmem_to_smem (!%p1360_p12), %s327_s18, 64, %s1242_s23, [#allocation15]  }
  0x50   : > { %p1616_p3 = scmp.eq.s32.totalorder (!%p1346_p10), %s1318_s8, 0 }
  0x53   : > { %1193 = dma.done.wait (%p1616_p3), [#allocation5], 32   ;;  %p1617_p4 = pmov %p1616_p3 }
  0x54   : > { %p1618_p0 = pmov %p1616_p3 }
  0x55   : > { %1195 = vsyncadd (%p1617_p4), [#allocation5], 4294967264 }
  0x56   : > { %1197 = dma.done.wait (%p1618_p0), [#allocation8], 16   ;;  %p1619_p9 = pmov %p1618_p0 }
  0x57   : > { %p1620_p7 = pmov %p1618_p0 }
  0x58   : > { %1199 = vsyncadd (%p1619_p9), [#allocation8], 4294967280 }
  0x59   : > { %1201 = dma.done.wait (%p1620_p7), [#allocation6], 64   ;;  %p1621_p12 = pmov %p1618_p0 }
  0x5a   : > { %p1622_p10 = pmov %p1618_p0 }
  0x5b   : > { %1203 = vsyncadd (%p1621_p12), [#allocation6], 4294967232 }
  0x5c   : > { %1205 = dma.done.wait (%p1622_p10), [#allocation8], 16   ;;  %p1623_p8 = pmov %p1618_p0 }
  0x5d   : > { %p1624_p11 = pmov %p1618_p0 }
  0x5e   : > { %1207 = vsyncadd (%p1623_p8), [#allocation8], 4294967280 }
  0x5f   : > { %1209 = dma.done.wait (%p1624_p11), [#allocation12], 80   ;;  %p1625_p1 = pmov %p1618_p0 }
  0x60   : > { %p1626_p13 = pmov %p1618_p0 }
  0x61   : > { %1211 = vsyncadd (%p1625_p1), [#allocation12], 4294967216 }
  0x62   : > { %1213 = dma.done.wait (%p1626_p13), [#allocation15], 64   ;;  %p1627_p2 = pmov %p1618_p0 }
  0x64   : > { %1215 = vsyncadd (%p1627_p2), [#allocation15], 4294967232 }
  0x65   : > { %379 = sfence }
  0x66   : > { %p408_p3 = scmp.lt.s32.totalorder %s1318_s8, 2  ;;  %s413_s22 = sld [smem:[#allocation3]] }
  0x67   : > { %s847_s15 = sld [smem:[#allocation3 + $0x80]] }
  0x68   : > { %s409_s29 = scalar_select %p408_p3, %s1318_s8, 2 }
  0x69   : > { %s423_s26 = sld [smem:[#allocation7]] }
  0x6a   : > { %s846_s24 = sshll.u32 %s409_s29, 1  ;;  %s1628_s0 = sld [smem:[#allocation24_spill]] }
  0x6b   : > { %s848_s10 = sld [smem:[#allocation3 + $0x1]] }
  0x6c   : > { %s849_s17 = sld [smem:[#allocation3 + $0x81]]  ;;  %v414_v1 = vstv %s413_s22 }
  0x6d   : > { %s850_s18 = sld [smem:[#allocation7 + $0x1]]  ;;  %v417_v2 = vstv %s847_s15 }
  0x6e   : > { %s851_s25 = sld [smem:[#allocation3 + $0x2]] }
  0x6f   : > { %s852_s23 = sld [smem:[#allocation3 + $0x82]]  ;;  %v424_v8 = vstv %s423_s26 }
  0x70   : > { %s411_s28 = scalar_lea.vmem %s1628_s0, %s846_s24  ;;  %s1442_s1 = sld [smem:[#allocation7 + $0x2]] }
  0x71   : > { %v412_v0 = vld [vmem:[%s411_s28] sm:$0x3]  ;;  %v427_v5 = vstv %s848_s10  ;;  %s854_s2 = sld [smem:[#allocation3 + $0x3]] }
  0x72   : > { %v415_v3 = vmul.f32 %v414_v1, %v412_v0  ;;  %v418_v4 = vmul.f32 %v417_v2, %v412_v0  ;;  %v430_v7 = vstv %s849_s17  ;;  %s855_s29 = sld [smem:[#allocation3 + $0x83]]  ;;  %v428_v9 = vmul.f32 %v427_v5, %v412_v0 }
  0x73   : > { %v431_v10 = vmul.f32 %v430_v7, %v412_v0  ;;  %s856_s22 = sld [smem:[#allocation7 + $0x3]]  ;;  %v437_v16 = vstv %s850_s18 }
  0x74   : > { %v420_v6 = vrot.slane %v418_v4, 1  ;;  %v440_v12 = vstv %s851_s25  ;;  %s1449_s15 = sld [smem:[#allocation9 + $0x100]] }
  0x75   : > { %v433_v13 = vrot.slane %v431_v10, 1  ;;  %v443_v14 = vstv %s852_s23  ;;  %v441_v17 = vmul.f32 %v440_v12, %v412_v0  ;;  %s1451_s24 = sld [smem:[#allocation9 + $0x180]] }
  0x76   : > { %v422_v11 = vadd.f32 %v420_v6, %v415_v3  ;;  %v444_v18 = vmul.f32 %v443_v14, %v412_v0  ;;  %v450_v25 = vstv %s1442_s1  ;;  %s1445_s1 = sld [smem:[#allocation9]] }
  0x77   : > { %v435_v19 = vadd.f32 %v433_v13, %v428_v9  ;;  %v453_v20 = vstv %s854_s2  ;;  %s1447_s2 = sld [smem:[#allocation9 + $0x80]] }
  0x78   : > { %v425_v15 = vadd.f32 %v424_v8, %v422_v11  ;;  %v446_v21 = vrot.slane %v444_v18, 1  ;;  %v456_v22 = vstv %s855_s29  ;;  %v454_v26 = vmul.f32 %v453_v20, %v412_v0  ;;  %s1453_s26 = sld [smem:[#allocation9 + $0x1]] }
  0x79   : > { %v438_v24 = vadd.f32 %v437_v16, %v435_v19  ;;  %v457_v27 = vmul.f32 %v456_v22, %v412_v0  ;;  %v463_v33 = vstv %s856_s22  ;;  %s1455_s27 = sld [smem:[#allocation9 + $0x81]] }
  0x7a   : > { %v465_v23 = vsub.f32 0.0, %v425_v15  ;;  %v448_v28 = vadd.f32 %v446_v21, %v441_v17  ;;  %s1457_s30 = sld [smem:[#allocation9 + $0x101]]  ;;  %v493_v63 = vstv %s1449_s15 }
  0x7b   : > { %v459_v30 = vrot.slane %v457_v27, 1  ;;  %v470_v31 = vsub.f32 0.0, %v438_v24  ;;  %s1459_s28 = sld [smem:[#allocation9 + $0x181]]  ;;  %v497_v7 = vstv %s1451_s24 }
  0x7c   : > { %v466_v29 = vmul.f32 1.442695, %v465_v23  ;;  %v451_v32 = vadd.f32 %v450_v25, %v448_v28  ;;  %s865_s10 = sld [smem:[#allocation9 + $0x2]]  ;;  %v486_v49 = vstv %s1445_s1 }
  0x7d   : > { %v461_v34 = vadd.f32 %v459_v30, %v454_v26  ;;  %v471_v35 = vmul.f32 1.442695, %v470_v31  ;;  %s870_s17 = sld [smem:[#allocation9 + $0x3]]  ;;  %v489_v54 = vstv %s1447_s2 }
  0x7e   : > { %1009 = vpow2.f32 %v466_v29  ;;  %v475_v36 = vsub.f32 0.0, %v451_v32  ;;  %s1461_s18 = sld [smem:[#allocation9 + $0x82]]  ;;  %v504_v50 = vstv %s1453_s26 }
  0x7f   : > { %v464_v37 = vadd.f32 %v463_v33, %v461_v34  ;;  %1011 = vpow2.f32 %v471_v35  ;;  %s1463_s25 = sld [smem:[#allocation9 + $0x83]]  ;;  %v507_v55 = vstv %s1455_s27 }
  0x80   : > { %v476_v38 = vmul.f32 1.442695, %v475_v36  ;;  %s1465_s23 = sld [smem:[#allocation9 + $0x102]]  ;;  %v511_v0 = vstv %s1457_s30 }
  0x81   : > { %v480_v39 = vsub.f32 0.0, %v464_v37  ;;  %s1467_s29 = sld [smem:[#allocation9 + $0x103]]  ;;  %v515_v8 = vstv %s1459_s28 }
  0x82   : > { %1013 = vpow2.f32 %v476_v38  ;;  %s1469_s22 = sld [smem:[#allocation9 + $0x182]]  ;;  %v522_v51 = vstv %s865_s10 }
  0x83   : > { %v481_v40 = vmul.f32 1.442695, %v480_v39  ;;  %s1471_s0 = sld [smem:[#allocation9 + $0x183]]  ;;  %v540_v52 = vstv %s870_s17 }
  0x84   : > { %s1475_s3 = sld [smem:[#allocation10]]  ;;  %v525_v56 = vstv %s1461_s18 }
  0x85   : > { %1015 = vpow2.f32 %v481_v40  ;;  %s1479_s4 = sld [smem:[#allocation10 + $0x1]]  ;;  %v543_v57 = vstv %s1463_s25 }
  0x86   : > { %s1483_s1 = sld [smem:[#allocation10 + $0x2]]  ;;  %v529_v1 = vstv %s1465_s23 }
  0x87   : > { %v547_v2 = vstv %s1467_s29  ;;  %s1489_s2 = sld [smem:[#allocation10 + $0x3]] }
  0x88   : > { %v533_v9 = vstv %s1469_s22  ;;  %s1505_s15 = sld [smem:[#allocation11 + $0x180]] }
  0x89   : > { %v551_v10 = vstv %s1471_s0  ;;  %s1499_s0 = sld [smem:[#allocation11]] }
  0x8a   : > { %v501_v29 = vstv %s1475_s3  ;;  %s1501_s3 = sld [smem:[#allocation11 + $0x80]] }
  0x8b   : > { %v1010_v41 = vpop.eup %1009  ;;  %v519_v30 = vstv %s1479_s4  ;;  %s1503_s4 = sld [smem:[#allocation11 + $0x100]] }
  0x8c   : > { %v468_v42 = vadd.f32 1.0, %v1010_v41  ;;  %v1012_v43 = vpop.eup %1011  ;;  %v537_v31 = vstv %s1483_s1  ;;  %s1507_s24 = sld [smem:[#allocation11 + $0x1]] }
  0x8d   : > { %v473_v44 = vadd.f32 1.0, %v1012_v43  ;;  %v555_v32 = vstv %s1489_s2  ;;  %s1509_s26 = sld [smem:[#allocation11 + $0x81]] }
  0x8e   : > { %1017 = vrcp.f32 %v468_v42  ;;  %s1511_s27 = sld [smem:[#allocation11 + $0x101]] }
  0x8f   : > { %v1014_v45 = vpop.eup %1013  ;;  %1019 = vrcp.f32 %v473_v44  ;;  %s1513_s30 = sld [smem:[#allocation11 + $0x181]] }
  0x90   : > { %v478_v46 = vadd.f32 1.0, %v1014_v45  ;;  %s1515_s28 = sld [smem:[#allocation11 + $0x2]] }
  0x91   : > { %s1517_s10 = sld [smem:[#allocation11 + $0x82]] }
  0x92   : > { %v1016_v47 = vpop.eup %1015  ;;  %1021 = vrcp.f32 %v478_v46  ;;  %s1519_s17 = sld [smem:[#allocation11 + $0x102]] }
  0x93   : > { %v483_v48 = vadd.f32 1.0, %v1016_v47  ;;  %s1521_s18 = sld [smem:[#allocation11 + $0x182]] }
  0x94   : > { %s888_s25 = sld [smem:[#allocation11 + $0x3]] }
  0x95   : > { %1023 = vrcp.f32 %v483_v48  ;;  %s1523_s23 = sld [smem:[#allocation11 + $0x83]] }
  0x96   : > { %s1525_s29 = sld [smem:[#allocation11 + $0x103]] }
  0x97   : > { %s1527_s22 = sld [smem:[#allocation11 + $0x183]] }
  0x98   : > { %s1533_s1 = sld [smem:[#allocation13]] }
  0x99   : > { %s1537_s2 = sld [smem:[#allocation13 + $0x1]] }
  0x9a   : > { %s1543_s5 = sld [smem:[#allocation13 + $0x2]] }
  0x9b   : > { %v1018_v53 = vpop.eup %1017 }
  0x9c   : > { %v487_v58 = vmul.f32 %v1018_v53, %v486_v49  ;;  %v505_v59 = vmul.f32 %v1018_v53, %v504_v50  ;;  %v523_v60 = vmul.f32 %v1018_v53, %v522_v51  ;;  %v541_v61 = vmul.f32 %v1018_v53, %v540_v52  ;;  %v1020_v62 = vpop.eup %1019 }
  0x9d   : > { %v490_v3 = vmul.f32 %v1020_v62, %v489_v54  ;;  %v508_v4 = vmul.f32 %v1020_v62, %v507_v55  ;;  %v526_v5 = vmul.f32 %v1020_v62, %v525_v56  ;;  %v544_v6 = vmul.f32 %v1020_v62, %v543_v57 }
  0x9e   : > { %v578_v57 = vstv %s1499_s0  ;;  %v599_v62 = vstv %s1509_s26  ;;  %s1550_s0 = sld [smem:[#allocation13 + $0x3]]  ;;  %s406_s26 = sand.u32 1, %s1226_s12  }
  0x9f   : > { %v1022_v11 = vpop.eup %1021  ;;  %v491_v12 = vadd.f32 %v490_v3, %v487_v58  ;;  %v509_v13 = vadd.f32 %v508_v4, %v505_v59  ;;  %v527_v14 = vadd.f32 %v526_v5, %v523_v60  ;;  %v545_v15 = vadd.f32 %v544_v6, %v541_v61 }
  0xa0   : > { %v494_v16 = vmul.f32 %v1022_v11, %v493_v63  ;;  %v512_v17 = vmul.f32 %v1022_v11, %v511_v0  ;;  %v530_v18 = vmul.f32 %v1022_v11, %v529_v1  ;;  %v548_v19 = vmul.f32 %v1022_v11, %v547_v2 }
  0xa1   : > { %v581_v58 = vstv %s1501_s3  ;;  %v585_v59 = vstv %s1503_s4  ;;  %v589_v60 = vstv %s1505_s15  ;;  %v596_v61 = vstv %s1507_s24  ;;  %s893_s3 = sld [smem:[#allocation14 + $0x80]] }
  0xa2   : > { %v1024_v20 = vpop.eup %1023  ;;  %v495_v21 = vadd.f32 %v494_v16, %v491_v12  ;;  %v513_v22 = vadd.f32 %v512_v17, %v509_v13  ;;  %v531_v23 = vadd.f32 %v530_v18, %v527_v14  ;;  %v549_v24 = vadd.f32 %v548_v19, %v545_v15  ;;  %s894_s4 = sld [smem:[#allocation14 + $0x100]] }
  0xa3   : > { %v498_v25 = vmul.f32 %v1024_v20, %v497_v7  ;;  %v516_v26 = vmul.f32 %v1024_v20, %v515_v8  ;;  %v534_v27 = vmul.f32 %v1024_v20, %v533_v9  ;;  %v552_v28 = vmul.f32 %v1024_v20, %v551_v10  ;;  %s895_s15 = sld [smem:[#allocation14 + $0x180]] }
  0xa4   : > { %v614_v63 = vstv %s1515_s28  ;;  %v632_v0 = vstv %s888_s25  ;;  %v603_v1 = vstv %s1511_s27  ;;  %v607_v2 = vstv %s1513_s30  ;;  %s684_s24 = sld [smem:[#allocation2]]  ;;  %s896_s27 = sshll.u32 %s1318_s8, 4 }
  0xa5   : > { %v499_v33 = vadd.f32 %v498_v25, %v495_v21  ;;  %v517_v34 = vadd.f32 %v516_v26, %v513_v22  ;;  %v535_v35 = vadd.f32 %v534_v27, %v531_v23  ;;  %v553_v36 = vadd.f32 %v552_v28, %v549_v24  ;;  %s407_s30 = scalar_lea.vmem [#allocation16], %s406_s26  ;;  %s689_s25 = scalar_lea.sflag [#allocation4], %s406_s26 }
  0xa6   : > { %v617_v3 = vstv %s1517_s10  ;;  %v635_v4 = vstv %s1523_s23  ;;  %v621_v6 = vstv %s1519_s17  ;;  %v625_v7 = vstv %s1521_s18  ;;  %s701_s28 = sshll.u32 %s407_s30, 4  ;;  %s699_s18 = scalar_lea.hbm %s1599_s9, %s896_s27  ;;  %s702_s28 = int_to_ptr.vmem [resolvable:$true] %s701_s28 }
  0xa7   : > { %v502_v37 = vadd.f32 %v501_v29, %v499_v33  ;;  %v520_v38 = vadd.f32 %v519_v30, %v517_v34  ;;  %v538_v39 = vadd.f32 %v537_v31, %v535_v35  ;;  %v556_v40 = vadd.f32 %v555_v32, %v553_v36  ;;  %s1150_s23 = scalar_lea.vmem %s702_s28, 16 }
  0xa8   : > { %v639_v8 = vstv %s1525_s29  ;;  %v643_v9 = vstv %s1527_s22  ;;  %v593_v35 = vstv %s1533_s1  ;;  %v611_v36 = vstv %s1537_s2  ;;  %p1151_p4 = scmp.ne.s32.totalorder %s702_s28, %s1150_s23  ;;  %s1243_s29 = smov [#allocation16]  }
  0xa9   : > { %v557_v41 = vsub.f32 0.0, %v502_v37  ;;  %v562_v42 = vsub.f32 0.0, %v520_v38  ;;  %v567_v43 = vsub.f32 0.0, %v538_v39  ;;  %v572_v44 = vsub.f32 0.0, %v556_v40  ;;  %s1154_s22 = sshll.u32 %s1243_s29, 4  ;;  %s1155_s22 = int_to_ptr.vmem [resolvable:$false] %s1154_s22 }
  0xaa   : > { %p1152_p0 = pnand %p1151_p4, %p1335_p5  ;;  %s1156_s8 = scalar_lea.vmem %s1155_s22, 32 }
  0xab   : > { %v558_v45 = vmul.f32 1.442695, %v557_v41  ;;  %v563_v46 = vmul.f32 1.442695, %v562_v42  ;;  %v568_v47 = vmul.f32 1.442695, %v567_v43  ;;  %v629_v41 = vstv %s1543_s5  ;;  %p1157_p7 = scmp.lt.s32.totalorder %s702_s28, %s1155_s22  ;;  %p1158_p12 = scmp.lt.s32.totalorder %s1156_s8, %s1150_s23 }
  0xac   : > { %v573_v48 = vmul.f32 1.442695, %v572_v44  ;;  %v647_v42 = vstv %s1550_s0  ;;  %s669_s5 = sld [smem:[#allocation14]]  ;;  %p1153_p9 = pneg %p1152_p0 }
  0xad   : > { %1025 = vpow2.f32 %v558_v45  ;;  %p1159_p10 = por %p1158_p12, %p1157_p7 }
  0xae   : > { %1027 = vpow2.f32 %v563_v46 }
  0xaf   : > { %1029 = vpow2.f32 %v568_v47  ;;  %p1160_p8 = pnand %p1159_p10, %p1153_p9 }
  0xb0   : > { %1031 = vpow2.f32 %v573_v48 }
  0xba   : > { %v1026_v49 = vpop.eup %1025 }
  0xbb   : > { %v1028_v50 = vpop.eup %1027  ;;  %v560_v51 = vadd.f32 1.0, %v1026_v49 }
  0xbc   : > { %v1030_v52 = vpop.eup %1029  ;;  %v565_v53 = vadd.f32 1.0, %v1028_v50 }
  0xbd   : > { %v1032_v54 = vpop.eup %1031  ;;  %1033 = vrcp.f32 %v560_v51  ;;  %v570_v55 = vadd.f32 1.0, %v1030_v52 }
  0xbe   : > { %1035 = vrcp.f32 %v565_v53  ;;  %v575_v56 = vadd.f32 1.0, %v1032_v54 }
  0xbf   : > { %1037 = vrcp.f32 %v570_v55 }
  0xc0   : > { %1039 = vrcp.f32 %v575_v56 }
  0xca   : > { %v1034_v5 = vpop.eup %1033 }
  0xcb   : > { %v1036_v10 = vpop.eup %1035  ;;  %v579_v11 = vmul.f32 %v1034_v5, %v578_v57  ;;  %v597_v12 = vmul.f32 %v1034_v5, %v596_v61  ;;  %v615_v13 = vmul.f32 %v1034_v5, %v614_v63  ;;  %v633_v14 = vmul.f32 %v1034_v5, %v632_v0 }
  0xcc   : > { %v1038_v15 = vpop.eup %1037  ;;  %v582_v16 = vmul.f32 %v1036_v10, %v581_v58  ;;  %v600_v17 = vmul.f32 %v1036_v10, %v599_v62  ;;  %v618_v18 = vmul.f32 %v1036_v10, %v617_v3  ;;  %v636_v19 = vmul.f32 %v1036_v10, %v635_v4 }
  0xcd   : > { %v1040_v20 = vpop.eup %1039  ;;  %v586_v21 = vmul.f32 %v1038_v15, %v585_v59  ;;  %v604_v22 = vmul.f32 %v1038_v15, %v603_v1  ;;  %v622_v23 = vmul.f32 %v1038_v15, %v621_v6  ;;  %v640_v24 = vmul.f32 %v1038_v15, %v639_v8 }
  0xce   : > { %v583_v25 = vadd.f32 %v582_v16, %v579_v11  ;;  %v590_v26 = vmul.f32 %v1040_v20, %v589_v60  ;;  %v601_v27 = vadd.f32 %v600_v17, %v597_v12  ;;  %v608_v28 = vmul.f32 %v1040_v20, %v607_v2 }
  0xcf   : > { %v619_v29 = vadd.f32 %v618_v18, %v615_v13  ;;  %v626_v30 = vmul.f32 %v1040_v20, %v625_v7  ;;  %v637_v31 = vadd.f32 %v636_v19, %v633_v14  ;;  %v644_v32 = vmul.f32 %v1040_v20, %v643_v9 }
  0xd0   : > { %v587_v33 = vadd.f32 %v586_v21, %v583_v25  ;;  %v605_v34 = vadd.f32 %v604_v22, %v601_v27  ;;  %v670_v1 = vstv %s669_s5  ;;  %v673_v2 = vstv %s893_s3 }
  0xd1   : > { %v623_v37 = vadd.f32 %v622_v23, %v619_v29  ;;  %v641_v38 = vadd.f32 %v640_v24, %v637_v31  ;;  %v677_v4 = vstv %s894_s4  ;;  %v681_v7 = vstv %s895_s15 }
  0xd2   : > { %v591_v39 = vadd.f32 %v590_v26, %v587_v33  ;;  %v609_v40 = vadd.f32 %v608_v28, %v605_v34  ;;  %v685_v15 = vstv %s684_s24 }
  0xd3   : > { %v627_v43 = vadd.f32 %v626_v30, %v623_v37  ;;  %v645_v44 = vadd.f32 %v644_v32, %v641_v38 }
  0xd4   : > { %v594_v45 = vadd.f32 %v593_v35, %v591_v39  ;;  %v612_v46 = vadd.f32 %v611_v36, %v609_v40 }
  0xd5   : > { %v630_v47 = vadd.f32 %v629_v41, %v627_v43  ;;  %v648_v48 = vadd.f32 %v647_v42, %v645_v44 }
  0xd6   : > { %v649_v49 = vsub.f32 0.0, %v594_v45  ;;  %v654_v50 = vsub.f32 0.0, %v612_v46 }
  0xd7   : > { %v659_v51 = vsub.f32 0.0, %v630_v47  ;;  %v664_v52 = vsub.f32 0.0, %v648_v48 }
  0xd8   : > { %v650_v53 = vmul.f32 1.442695, %v649_v49  ;;  %v655_v54 = vmul.f32 1.442695, %v654_v50 }
  0xd9   : > { %v660_v55 = vmul.f32 1.442695, %v659_v51  ;;  %v665_v56 = vmul.f32 1.442695, %v664_v52 }
  0xda   : > { %1041 = vpow2.f32 %v650_v53 }
  0xdb   : > { %1043 = vpow2.f32 %v655_v54 }
  0xdc   : > { %1045 = vpow2.f32 %v660_v55 }
  0xdd   : > { %1047 = vpow2.f32 %v665_v56 }
  0xe7   : > { %v1042_v57 = vpop.eup %1041 }
  0xe8   : > { %v1044_v58 = vpop.eup %1043  ;;  %v652_v59 = vadd.f32 1.0, %v1042_v57 }
  0xe9   : > { %v1046_v60 = vpop.eup %1045  ;;  %v657_v61 = vadd.f32 1.0, %v1044_v58 }
  0xea   : > { %v1048_v62 = vpop.eup %1047  ;;  %1049 = vrcp.f32 %v652_v59  ;;  %v662_v63 = vadd.f32 1.0, %v1046_v60 }
  0xeb   : > { %1051 = vrcp.f32 %v657_v61  ;;  %v667_v0 = vadd.f32 1.0, %v1048_v62 }
  0xec   : > { %1053 = vrcp.f32 %v662_v63 }
  0xed   : > { %1055 = vrcp.f32 %v667_v0 }
  0xf7   : > { %v1050_v3 = vpop.eup %1049 }
  0xf8   : > { %v1052_v5 = vpop.eup %1051  ;;  %v671_v6 = vmul.f32 %v1050_v3, %v670_v1 }
  0xf9   : > { %v1054_v8 = vpop.eup %1053  ;;  %v674_v9 = vmul.f32 %v1052_v5, %v673_v2 }
  0xfa   : > { %v1056_v10 = vpop.eup %1055  ;;  %v678_v11 = vmul.f32 %v1054_v8, %v677_v4 }
  0xfb   : > { %v675_v12 = vadd.f32 %v674_v9, %v671_v6  ;;  %v682_v13 = vmul.f32 %v1056_v10, %v681_v7 }
  0xfd   : > { %v679_v14 = vadd.f32 %v678_v11, %v675_v12 }
  0xff   : > { %v683_v16 = vadd.f32 %v682_v13, %v679_v14 }
 0x101   : > { %v686_v17 = vadd.f32 %v685_v15, %v683_v16 }
 0x103   : > { %687 = vst [vmem:[%s407_s30] sm:$0x1] %v686_v17 }
 0x104   : > { %1163 = shalt.err (!%p1160_p8)
}
 0x105   : > { %s1164_s1 = scalar_lea.hbm %s699_s18, 16  ;;  %s1168_s5 = scalar_lea.hbm %s1599_s9, 48 }
 0x106   : > { %p1165_p11 = scmp.ne.s32.totalorder %s699_s18, %s1164_s1  ;;  %p1169_p2 = scmp.lt.s32.totalorder %s699_s18, %s1599_s9 }
 0x107   : > { %p1170_p3 = scmp.lt.s32.totalorder %s1168_s5, %s1164_s1 }
 0x108   : > { %p1166_p1 = pnand %p1165_p11, %p1335_p5 }
 0x109   : > { %p1171_p4 = por %p1170_p3, %p1169_p2 }
 0x10a   : > { %p1167_p13 = pneg %p1166_p1 }
 0x10c   : > { %p1172_p0 = pnand %p1171_p4, %p1167_p13 }
 0x10e   : > { %1175 = shalt.err (!%p1172_p0)
}
 0x10f   : > { %927 = dma.vmem_to_hbm [thread:$0]  (%p1335_p5), %s702_s28, 16, %s699_s18, %s689_s25  }
 0x110 PF: > { %p969_p9 = scmp.ge.s32.totalorder %s1234_s14, 2  ;;  %s713_s15 = sand.u32 1, %s1222_s11  }
 0x111   : > { %s714_s24 = scalar_lea.sflag [#allocation4], %s713_s15 }
 0x112   : > { %p952_p7 = pnand %p969_p9, %p1339_p6 }
 0x114   : > { %p953_p12 = pneg %p952_p7 }
 0x116   : > { %1217 = dma.done.wait (%p953_p12), %s714_s24, 16  }
 0x117   : > { %1219 = vsyncadd (%p953_p12), %s714_s24, 4294967280  ;;  %p25_p10 = scmp.ge.s32.totalorder %s1322_s16, 5   ;;  %s1629_s11 = smov %s1226_s12 }
 0x118   : > { %s1630_s12 = smov %s1230_s13  ;;  %s1631_s13 = smov %s1333_s19 }
 0x119   : > { %s1632_s14 = smov %s1322_s16  ;;  %27 = sbr.rel (!%p25_p10) target bundleno = 16 (0x10), region = 121 }
 0x11e   :  { %718 = vsyncpa [#allocation4], 1 }
 0x11f   :  { %720 = vsyncpa [#allocation4 + $0x1], 1 }
 0x120   :  { %721 = vsyncpa [#allocation5], 1 }
 0x121   :  { %723 = vsyncpa [#allocation5 + $0x1], 1 }
 0x122   :  { %724 = vsyncpa [#allocation8], 1 }
 0x123   :  { %725 = vsyncpa [#allocation6], 1 }
 0x124   :  { %727 = vsyncpa [#allocation6 + $0x1], 1 }
 0x125   :  { %728 = vsyncpa [#allocation12], 1 }
 0x126   :  { %729 = vsyncpa [#allocation15], 1 }

</bundles_post_ra>
